<compile_context>
chip_gen: v6e
topology: v6e:2x2x1
jax: 0.10.0
libtpu: 0.0.40
codegen_flags: <defaults>
</compile_context>

<pallas_src>
import functools
import math

import jax
import jax.numpy as jnp
from jax import lax
from jax.experimental import pallas as pl
from jax.experimental.pallas import tpu as pltpu

_BN_EPS = 1e-5
_INV_SQRT2 = 1.0 / math.sqrt(2.0)


def _round_up(x, m):
    return ((x + m - 1) // m) * m


# ------------------------------------------------------------------ tiling / VMEM sizing
def _pick_tile_n(n_rows, k):
    """Rows per grid step: ~3 MiB of streamed bf16 cols per step, per-stage."""
    target_bytes = 3 << 20
    tn = max(256, min(4096, target_bytes // max(1, 2 * k)))   # bf16 cols tile
    tn = max(64, (tn // 64) * 64)
    tn = min(tn, n_rows)                      # n_rows is a multiple of 16
    tn = max(16, (tn // 16) * 16)
    if n_rows >= 32 and tn >= n_rows:
        # Keep >= 2 grid steps so v7x's two TensorCores can split the row tiles.
        tn = _round_up((n_rows + 1) // 2, 16)
    return tn


def _vmem_limit_bytes(tn, k, cout, out_itemsize):
    """Scoped-VMEM limit from the actual tile footprint (+50% and 4 MiB headroom)."""
    footprint = (2 * tn * k * 2              # double-buffered bf16 cols tile
                 + 2 * k * cout * 2          # resident bf16 weights (conservatively x2)
                 + 2 * 3 * cout * 4          # bias (+ optional affine) in f32
                 + 2 * tn * cout * out_itemsize)   # double-buffered output tile
    limit = int(footprint * 1.5) + (4 << 20)
    return int(max(16 << 20, min(limit, 56 << 20)))


# ------------------------------------------------------------------ Pallas kernels
def _gelu_exact_f32(y):
    # exact GELU: 0.5*x*(1+erf(x/sqrt(2))) -- f32 epilogue (v5e has no bf16 VPU/EUP)
    return 0.5 * y * (1.0 + lax.erf(y * _INV_SQRT2))


def _conv_stage_kernel(x_ref, w_ref, b_ref, o_ref, *, apply_gelu):
    """x:(tn,K) bf16, w:(K,Cout) bf16 (BN scale folded in), b:(1,Cout) f32."""
    y = jnp.dot(x_ref[...], w_ref[...], preferred_element_type=jnp.float32)
    y = y + b_ref[...]
    if apply_gelu:
        y = _gelu_exact_f32(y)
    o_ref[...] = y.astype(o_ref.dtype)


def _conv_stage_affine_kernel(x_ref, w_ref, b_ref, a_ref, be_ref, o_ref, *, apply_gelu):
    """Same as above plus a post-Affine epilogue (needed when GELU precedes it)."""
    y = jnp.dot(x_ref[...], w_ref[...], preferred_element_type=jnp.float32)
    y = y + b_ref[...]
    if apply_gelu:
        y = _gelu_exact_f32(y)
    o_ref[...] = (y * a_ref[...] + be_ref[...]).astype(o_ref.dtype)


def _conv_block_pallas(cols, w, bias, affine, *, apply_gelu, out_dtype):
    """Fused conv-as-matmul stage.

    cols : (N, K)    im2col rows (N = B*Ho*Wo), K = 9*Cin   -- true K, no lane padding
    w    : (K, Cout) conv weights with BN scale (and optionally affines) folded in
    bias : (Cout,)   folded conv-bias + BN bias (f32)
    affine : None or (alpha, beta), each (Cout,) -- only when GELU precedes post-Affine
    """
    n, k = cols.shape
    cout = w.shape[1]

    n_rows = _round_up(n, 16)                 # bf16 sublane packing; usually a no-op
    if n_rows != n:
        cols = jnp.pad(cols, ((0, n_rows - n), (0, 0)))

    tn = _pick_tile_n(n_rows, k)
    grid = (pl.cdiv(n_rows, tn),)

    args = [cols.astype(jnp.bfloat16), w.astype(jnp.bfloat16),
            bias.reshape(1, cout).astype(jnp.float32)]
    in_specs = [
        pl.BlockSpec((tn, k), lambda i: (i, 0)),     # streamed / double-buffered rows
        pl.BlockSpec((k, cout), lambda i: (0, 0)),   # resident folded weights
        pl.BlockSpec((1, cout), lambda i: (0, 0)),   # resident bias
    ]
    if affine is None:
        kernel = functools.partial(_conv_stage_kernel, apply_gelu=apply_gelu)
    else:
        alpha, beta = affine
        args += [alpha.reshape(1, cout).astype(jnp.float32),
                 beta.reshape(1, cout).astype(jnp.float32)]
        in_specs += [pl.BlockSpec((1, cout), lambda i: (0, 0)),
                     pl.BlockSpec((1, cout), lambda i: (0, 0))]
        kernel = functools.partial(_conv_stage_affine_kernel, apply_gelu=apply_gelu)

    out_itemsize = jnp.dtype(out_dtype).itemsize
    out = pl.pallas_call(
        kernel,
        out_shape=jax.ShapeDtypeStruct((n_rows, cout), out_dtype),
        grid=grid,
        in_specs=in_specs,
        out_specs=pl.BlockSpec((tn, cout), lambda i: (i, 0)),
        compiler_params=pltpu.CompilerParams(
            dimension_semantics=("parallel",),       # row tiles shard across v7x's 2 TCs
            vmem_limit_bytes=_vmem_limit_bytes(tn, k, cout, out_itemsize)),
        cost_estimate=pl.CostEstimate(
            flops=2 * n_rows * k * cout,
            transcendentals=n_rows * cout if apply_gelu else 0,
            bytes_accessed=n_rows * k * 2 + k * cout * 2 + n_rows * cout * out_itemsize),
    )(*args)
    return out if n_rows == n else out[:n]


# ------------------------------------------------------------------ glue: im2col
def _im2col_3x3_s2_p1(x_nhwc):
    """3x3 / stride-2 / pad-1 patch extraction; column ordering = (kh, kw, cin)."""
    xp = jnp.pad(x_nhwc, ((0, 0), (1, 1), (1, 1), (0, 0)))
    B, Hp, Wp, C = xp.shape
    Ho = (Hp - 3) // 2 + 1
    Wo = (Wp - 3) // 2 + 1
    taps = []
    for kh in range(3):
        for kw in range(3):
            taps.append(xp[:, kh:kh + 2 * Ho:2, kw:kw + 2 * Wo:2, :])
    patches = jnp.concatenate(taps, axis=-1)             # (B, Ho, Wo, 9*C)
    return patches.reshape(B * Ho * Wo, 9 * C), Ho, Wo


# ------------------------------------------------------------------ parameters
def init_sope_params(key, patch_size, embed_dim):
    if patch_size == 16:
        dims = [3, embed_dim // 8, embed_dim // 4, embed_dim // 2, embed_dim]
        gelu_flags = [True, True, True, False]
    elif patch_size == 4:
        dims = [3, embed_dim // 2, embed_dim]
        gelu_flags = [True, False]
    elif patch_size == 2:
        dims = [3, embed_dim]
        gelu_flags = [True]
    else:
        raise ValueError("patch_size must be 2, 4 or 16")

    convs = []
    for i in range(len(dims) - 1):
        cin, cout = dims[i], dims[i + 1]
        key, k1, k2, k3, k4, k5 = jax.random.split(key, 6)
        w = jax.random.normal(k1, (3, 3, cin, cout), jnp.float32) / math.sqrt(9 * cin)
        convs.append(dict(
            w_hwio=w,
            conv_b=0.02 * jax.random.normal(k2, (cout,), jnp.float32),
            gamma=1.0 + 0.1 * jax.random.normal(k3, (cout,), jnp.float32),
            beta=0.02 * jax.random.normal(k4, (cout,), jnp.float32),
            mean=0.05 * jax.random.normal(k5, (cout,), jnp.float32),
            var=jnp.ones((cout,), jnp.float32),
            gelu=gelu_flags[i],
        ))
    key, ka1, ka2, ka3, ka4 = jax.random.split(key, 5)
    return dict(
        convs=convs,
        # Affine params (randomized so the folding paths are actually exercised;
        # the PyTorch __init__ starts them at ones / zeros).
        pre_alpha=1.0 + 0.1 * jax.random.normal(ka1, (3,), jnp.float32),
        pre_beta=0.02 * jax.random.normal(ka2, (3,), jnp.float32),
        post_alpha=1.0 + 0.1 * jax.random.normal(ka3, (embed_dim,), jnp.float32),
        post_beta=0.02 * jax.random.normal(ka4, (embed_dim,), jnp.float32),
    )


def prepare_stage_params(params):
    """One-time host-side folding: conv-bias + eval-mode BN (+ affines) -> (w, b)."""
    stages = []
    n = len(params["convs"])
    pre_alpha = params["pre_alpha"]
    for i, blk in enumerate(params["convs"]):
        cin, cout = blk["w_hwio"].shape[2], blk["w_hwio"].shape[3]
        scale = blk["gamma"] / jnp.sqrt(blk["var"] + _BN_EPS)          # (Cout,)
        w = blk["w_hwio"].reshape(9 * cin, cout) * scale[None, :]      # rows = (kh,kw,cin)
        b = (blk["conv_b"] - blk["mean"]) * scale + blk["beta"]
        if i == 0:
            # Fold pre-Affine's alpha into the first conv's weights (per input channel).
            # The residual "+ pre_beta/pre_alpha" shift is applied to the input BEFORE
            # zero-padding so padded taps stay exactly zero (folding pre_beta into the
            # bias would be wrong at image borders).
            w = w * jnp.tile(pre_alpha, 9)[:, None]
        affine = None
        if i == n - 1:
            if blk["gelu"]:
                # GELU sits between BN and the post-Affine (patch_size == 2):
                # keep the affine as an in-kernel epilogue.
                affine = (params["post_alpha"], params["post_beta"])
            else:
                # No GELU after the last BN: fold the post-Affine into weights/bias.
                w = w * params["post_alpha"][None, :]
                b = b * params["post_alpha"] + params["post_beta"]
        stages.append(dict(w=w.astype(jnp.bfloat16),
                           b=b.astype(jnp.float32),
                           affine=affine,
                           gelu=bool(blk["gelu"])))
    return dict(stages=stages,
                pre_shift=(params["pre_beta"] / pre_alpha).astype(jnp.float32))


# ------------------------------------------------------------------ forward
def sope_forward(x_nchw, prepped):
    stages = prepped["stages"]
    # pre-Affine: alpha folded into stage-1 weights, only the shift remains (see above)
    x = x_nchw + prepped["pre_shift"][None, :, None, None]
    x = jnp.transpose(x, (0, 2, 3, 1)).astype(jnp.bfloat16)           # NCHW -> NHWC, bf16
    B = x.shape[0]
    n_stages = len(stages)
    for i, st in enumerate(stages):
        cols, Ho, Wo = _im2col_3x3_s2_p1(x)
        is_last = i == n_stages - 1
        y = _conv_block_pallas(cols, st["w"], st["b"], st["affine"],
                               apply_gelu=st["gelu"],
                               out_dtype=jnp.float32 if is_last else jnp.bfloat16)
        x = y.reshape(B, Ho, Wo, -1)
    B, Ho, Wo, C = x.shape
    return x.reshape(B, Ho * Wo, C)            # == flatten(2).transpose(1,2) of NCHW


# ------------------------------------------------------------------ pure-JAX reference
def sope_reference(x_nchw, params):
    x = x_nchw * params["pre_alpha"][None, :, None, None] + params["pre_beta"][None, :, None, None]
    x = jnp.transpose(x, (0, 2, 3, 1))
    for blk in params["convs"]:
        y = lax.conv_general_dilated(
            x, blk["w_hwio"], window_strides=(2, 2), padding=((1, 1), (1, 1)),
            dimension_numbers=("NHWC", "HWIO", "NHWC"))
        y = y + blk["conv_b"]
        y = (y - blk["mean"]) / jnp.sqrt(blk["var"] + _BN_EPS) * blk["gamma"] + blk["beta"]
        if blk["gelu"]:
            y = 0.5 * y * (1.0 + lax.erf(y * _INV_SQRT2))
        x = y
    x = x * params["post_alpha"] + params["post_beta"]
    B, Ho, Wo, C = x.shape
    return x.reshape(B, Ho * Wo, C)


if __name__ == "__main__":
    patch_size = 4          # proj = conv3x3(3, D/2)+BN, GELU, conv3x3(D/2, D)+BN
    embed_dim = 32
    B, H, W = 2, 16, 16

    key = jax.random.PRNGKey(0)
    kx, kp = jax.random.split(key)
    x = jax.random.normal(kx, (B, 3, H, W), jnp.float32)
    params = init_sope_params(kp, patch_size, embed_dim)

    prepped = prepare_stage_params(params)                    # hoisted, one-time prep
    fwd = jax.jit(lambda inp: sope_forward(inp, prepped))

    out = jax.block_until_ready(fwd(x))
    assert out.shape == (B, (H // patch_size) * (W // patch_size), embed_dim), out.shape

    ref = jax.block_until_ready(sope_reference(x, params))
    max_err = float(jnp.max(jnp.abs(out - ref)))
    # bf16 MXU operands + bf16 intermediate activations vs an all-f32 reference.
    assert jnp.allclose(out, ref, atol=3e-2, rtol=3e-2), max_err

    print("KERNEL_OK")
</pallas_src>

<mosaic_0001>
module attributes {stable_mosaic.version = 11 : i64} {
  func.func @_conv_stage_kernel(%arg0: i32, %arg1: memref<64x27xbf16, #tpu.memory_space<vmem>>, %arg2: memref<27x16xbf16, #tpu.memory_space<vmem>>, %arg3: memref<1x16xf32, #tpu.memory_space<vmem>>, %arg4: memref<64x16xbf16, #tpu.memory_space<vmem>>) attributes {dimension_semantics = [#tpu.dimension_semantics<parallel>], iteration_bounds = array<i64: 2>, scalar_prefetch = 0 : i64, scratch_operands = 0 : i64, tpu.core_type = #tpu.core_type<tc>, window_params = [{transform_indices = @transform_0, window_bounds = array<i64: 64, 27>}, {pipeline_mode = #tpu.pipeline_mode<synchronous>, transform_indices = @transform_1, window_bounds = array<i64: 27, 16>}, {pipeline_mode = #tpu.pipeline_mode<synchronous>, transform_indices = @transform_2, window_bounds = array<i64: 1, 16>}, {transform_indices = @transform_3, window_bounds = array<i64: 64, 16>}]} {
    %c0 = arith.constant 0 : index
    %c0_0 = arith.constant 0 : index
    %0 = vector.load %arg1[%c0, %c0_0] : memref<64x27xbf16, #tpu.memory_space<vmem>>, vector<64x27xbf16>
    %c0_1 = arith.constant 0 : index
    %c0_2 = arith.constant 0 : index
    %1 = vector.load %arg2[%c0_1, %c0_2] : memref<27x16xbf16, #tpu.memory_space<vmem>>, vector<27x16xbf16>
    %cst = arith.constant dense<0.000000e+00> : vector<64x16xf32>
    %2 = tpu.matmul %0, %1, %cst {dimension_numbers = #tpu.dot_dimension_numbers<[1], [0], [0], [1], [0, 0, 1, 1], [], []>} : vector<64x27xbf16>, vector<27x16xbf16>, vector<64x16xf32> -> vector<64x16xf32>
    %c0_3 = arith.constant 0 : index
    %c0_4 = arith.constant 0 : index
    %3 = vector.load %arg3[%c0_3, %c0_4] : memref<1x16xf32, #tpu.memory_space<vmem>>, vector<1x16xf32>
    %4 = vector.broadcast %3 : vector<1x16xf32> to vector<64x16xf32>
    %5 = arith.addf %2, %4 : vector<64x16xf32>
    %cst_5 = arith.constant 5.000000e-01 : f32
    %6 = vector.broadcast %cst_5 : f32 to vector<64x16xf32>
    %7 = arith.mulf %6, %5 : vector<64x16xf32>
    %cst_6 = arith.constant 0.707106769 : f32
    %8 = vector.broadcast %cst_6 : f32 to vector<64x16xf32>
    %9 = arith.mulf %5, %8 : vector<64x16xf32>
    %10 = math.erf %9 : vector<64x16xf32>
    %cst_7 = arith.constant 1.000000e+00 : f32
    %11 = vector.broadcast %cst_7 : f32 to vector<64x16xf32>
    %12 = arith.addf %11, %10 : vector<64x16xf32>
    %13 = arith.mulf %7, %12 : vector<64x16xf32>
    %14 = arith.truncf %13 : vector<64x16xf32> to vector<64x16xbf16>
    %c0_8 = arith.constant 0 : index
    %c0_9 = arith.constant 0 : index
    %15 = vector.load %arg4[%c0_8, %c0_9] : memref<64x16xbf16, #tpu.memory_space<vmem>>, vector<64x16xbf16>
    tpu.vector_store %arg4[%c0_8, %c0_9], %14 {strides = array<i32>} : memref<64x16xbf16, #tpu.memory_space<vmem>>, vector<64x16xbf16>,
    return
  }
  func.func @transform_0(%arg0: i32) -> (i32, i32) {
    %c0_i32 = arith.constant 0 : i32
    %c0_i32_0 = arith.constant 0 : i32
    return %arg0, %c0_i32 : i32, i32
  }
  func.func @transform_1(%arg0: i32) -> (i32, i32) {
    %c0_i32 = arith.constant 0 : i32
    %c0_i32_0 = arith.constant 0 : i32
    %c0_i32_1 = arith.constant 0 : i32
    return %c0_i32, %c0_i32_0 : i32, i32
  }
  func.func @transform_2(%arg0: i32) -> (i32, i32) {
    %c0_i32 = arith.constant 0 : i32
    %c0_i32_0 = arith.constant 0 : i32
    %c0_i32_1 = arith.constant 0 : i32
    return %c0_i32, %c0_i32_0 : i32, i32
  }
  func.func @transform_3(%arg0: i32) -> (i32, i32) {
    %c0_i32 = arith.constant 0 : i32
    %c0_i32_0 = arith.constant 0 : i32
    return %arg0, %c0_i32 : i32, i32
  }
}

module attributes {stable_mosaic.version = 11 : i64} {
  func.func @_conv_stage_kernel(%arg0: i32, %arg1: memref<16x144xbf16, #tpu.memory_space<vmem>>, %arg2: memref<144x32xbf16, #tpu.memory_space<vmem>>, %arg3: memref<1x32xf32, #tpu.memory_space<vmem>>, %arg4: memref<16x32xf32, #tpu.memory_space<vmem>>) attributes {dimension_semantics = [#tpu.dimension_semantics<parallel>], iteration_bounds = array<i64: 2>, scalar_prefetch = 0 : i64, scratch_operands = 0 : i64, tpu.core_type = #tpu.core_type<tc>, window_params = [{transform_indices = @transform_0, window_bounds = array<i64: 16, 144>}, {pipeline_mode = #tpu.pipeline_mode<synchronous>, transform_indices = @transform_1, window_bounds = array<i64: 144, 32>}, {pipeline_mode = #tpu.pipeline_mode<synchronous>, transform_indices = @transform_2, window_bounds = array<i64: 1, 32>}, {transform_indices = @transform_3, window_bounds = array<i64: 16, 32>}]} {
    %c0 = arith.constant 0 : index
    %c0_0 = arith.constant 0 : index
    %0 = vector.load %arg1[%c0, %c0_0] : memref<16x144xbf16, #tpu.memory_space<vmem>>, vector<16x144xbf16>
    %c0_1 = arith.constant 0 : index
    %c0_2 = arith.constant 0 : index
    %1 = vector.load %arg2[%c0_1, %c0_2] : memref<144x32xbf16, #tpu.memory_space<vmem>>, vector<144x32xbf16>
    %cst = arith.constant dense<0.000000e+00> : vector<16x32xf32>
    %2 = tpu.matmul %0, %1, %cst {dimension_numbers = #tpu.dot_dimension_numbers<[1], [0], [0], [1], [0, 0, 1, 1], [], []>} : vector<16x144xbf16>, vector<144x32xbf16>, vector<16x32xf32> -> vector<16x32xf32>
    %c0_3 = arith.constant 0 : index
    %c0_4 = arith.constant 0 : index
    %3 = vector.load %arg3[%c0_3, %c0_4] : memref<1x32xf32, #tpu.memory_space<vmem>>, vector<1x32xf32>
    %4 = vector.broadcast %3 : vector<1x32xf32> to vector<16x32xf32>
    %5 = arith.addf %2, %4 : vector<16x32xf32>
    %c0_5 = arith.constant 0 : index
    %c0_6 = arith.constant 0 : index
    %6 = vector.load %arg4[%c0_5, %c0_6] : memref<16x32xf32, #tpu.memory_space<vmem>>, vector<16x32xf32>
    tpu.vector_store %arg4[%c0_5, %c0_6], %5 {strides = array<i32>} : memref<16x32xf32, #tpu.memory_space<vmem>>, vector<16x32xf32>,
    return
  }
  func.func @transform_0(%arg0: i32) -> (i32, i32) {
    %c0_i32 = arith.constant 0 : i32
    %c0_i32_0 = arith.constant 0 : i32
    return %arg0, %c0_i32 : i32, i32
  }
  func.func @transform_1(%arg0: i32) -> (i32, i32) {
    %c0_i32 = arith.constant 0 : i32
    %c0_i32_0 = arith.constant 0 : i32
    %c0_i32_1 = arith.constant 0 : i32
    return %c0_i32, %c0_i32_0 : i32, i32
  }
  func.func @transform_2(%arg0: i32) -> (i32, i32) {
    %c0_i32 = arith.constant 0 : i32
    %c0_i32_0 = arith.constant 0 : i32
    %c0_i32_1 = arith.constant 0 : i32
    return %c0_i32, %c0_i32_0 : i32, i32
  }
  func.func @transform_3(%arg0: i32) -> (i32, i32) {
    %c0_i32 = arith.constant 0 : i32
    %c0_i32_0 = arith.constant 0 : i32
    return %arg0, %c0_i32 : i32, i32
  }
}

</mosaic_0001>

<bundles_post_ra>
// kernel: _lambda_.2
= control target key start
LH: loop header
LB: loop body
LE: loop exit
PB: predicated region body
PF: predicated region fallthrough
CT: control target
= control target key end

     0   :  { %s567_s12 = smov 0   ;;  %s618_s0 = inlined_call_operand.vmem [shape: bf16[128,27], index: 0, kind: input, shape index: {}]   ;;  %s619_s1 = inlined_call_operand.vmem [shape: bf16[27,16], index: 1, kind: input, shape index: {}]   ;;  %s620_s2 = inlined_call_operand.vmem [shape: f32[1,16], index: 2, kind: input, shape index: {}]   ;;  %s621_s3 = inlined_call_operand.vmem [shape: bf16[128,16], index: 3, kind: output, shape index: {}]  }
   0x1 LB: > { %s447_s13 = sadd.s32 4294967295, %s544_s12   ;;  %p451_p0 = scmp.ge.s32.totalorder %s544_s12, 1  ;;  %s544_s12 = sphi %s567_s12, %s13_s12  }
   0x2   : > { %p138_p1 = scmp.lt.s32.totalorder %s544_s12, 3 }
   0x4   : > { %p139_p2 = pnand %p451_p0, %p138_p1 }
   0x5   : > { %s452_s16 = sshll.u32 (!%p139_p2), %s447_s13, 3 }
   0x6   : > { %142 = sbr.rel (%p139_p2) target bundleno = 249 (0xf9), region = 32  ;;  %p163_p3 = scmp.lt.s32.totalorder (!%p139_p2), %s452_s16, 15 }
   0xb   : > { %v516_v0 = vld [vmem:[%s619_s1 + $0x8] sm:$0x3f]   ;;  %vm238_vm0 = vcmask 1044480   ;;  %vm239_vm1 = vcmask 1045504   ;;  %v546_v1 = vmov 65535   ;;  %v517_v5 = vld [vmem:[%s619_s1] sm:$0xff]  }
   0xc   : > { %v240_v2 = vsel %vm238_vm0, 4294967295, %v546_v1  ;;  %s623_s16 = smov (!%p163_p3, %s452_s16), 15  ;;  %vm225_vm2 = vcmask 220160   ;;  %v456_v10 = vld [vmem:[%s620_s2] ss:$0 sm:$0xff]  ;;  %vm382_vm3 = vcmask 125952  }
   0xd   : > { %v241_v3 = vsel %vm239_vm1, %v240_v2, 0  ;;  %s453_s19 = sshll.u32 %s623_s16, 2 }
   0xe   : > { %v243_v4 = vand.u32 %v516_v0, %v241_v3  ;;  %s166_s22 = scalar_lea.vmem %s618_s0, %s453_s19  ;;  %s597_s27 = scalar_lea.vmem %s621_s3, %s453_s19 }
   0xf   : > { %v518_v6 = vld [vmem:[%s166_s22] sm:$0xff]   ;;  %v519_v7 = vld [vmem:[%s166_s22 + $0x10] sm:$0xff]   ;;  %v520_v8 = vld [vmem:[%s166_s22 + $0x8] sm:$0xff]  }
  0x10   : > { %491 = vmatprep.subr.bf16.mxu0 %v243_v4  ;;  %503 = vmatprep.subr.bf16.mxu1 %v243_v4  ;;  %v521_v9 = vld [vmem:[%s166_s22 + $0x18] sm:$0xff]  }
  0x11   : > { %492 = vmatpush3.bf16.msra.mxu0 %v243_v4  ;;  %505 = vmatpush3.bf16.msra.mxu1 %v243_v4 }
  0x12   : > { %493 = vmatprep.subr.bf16.mxu0 %v517_v5  ;;  %504 = vmatprep.subr.bf16.mxu1 %v517_v5 }
  0x13   : > { %495 = vmatprep.mubr.msk.bf16.mxu0 %vm225_vm2, %v518_v6  ;;  %499 = vmatprep.mubr.msk.bf16.mxu1 %vm225_vm2, %v519_v7 }
  0x15   : > { %494 = vmatpush3.bf16.msra.mxu0 %v517_v5  ;;  %506 = vmatpush3.bf16.msra.mxu1 %v517_v5 }
  0x18   : > { %496 = vmatmul.mubr.msk.bf16.vlgmr.msra.gmra.mxu0 %vm225_vm2, %v520_v8  ;;  %500 = vmatmul.mubr.msk.bf16.vlgmr.msra.gmra.mxu1 %vm225_vm2, %v521_v9 }
  0xd8   : > { %v497_v11 = vpop.f32.mrf.mxu0  ;;  %v501_v12 = vpop.f32.mrf.mxu1 }
  0xd9   : > { %v288_v13 = vadd.f32 %v497_v11, %v456_v10  ;;  %v304_v14 = vadd.f32 %v501_v12, %v456_v10 }
  0xda   : > { %v279_v15 = vpop.f32.mrf.mxu0  ;;  %v295_v16 = vpop.f32.mrf.mxu1 }
  0xdb   : > { %v320_v17 = vmul.f32 0.70710677, %v288_v13  ;;  %v324_v18 = vmul.f32 0.70710677, %v304_v14  ;;  %v280_v19 = vadd.f32 %v456_v10, %v279_v15  ;;  %v296_v20 = vadd.f32 %v456_v10, %v295_v16 }
  0xdc   : > { %v498_v21 = vpop.f32.mrf.mxu0  ;;  %v502_v22 = vpop.f32.mrf.mxu1  ;;  %v312_v37 = vmul.f32 0.5, %v288_v13  ;;  %v316_v39 = vmul.f32 0.5, %v304_v14 }
  0xdd   : > { %522 = verf.f32 %v320_v17  ;;  %v291_v23 = vadd.f32 %v498_v21, %v456_v10  ;;  %v307_v24 = vadd.f32 %v502_v22, %v456_v10  ;;  %v318_v25 = vmul.f32 0.70710677, %v280_v19 }
  0xde   : > { %524 = verf.f32 %v324_v18  ;;  %v282_v26 = vpop.f32.mrf.mxu0  ;;  %v298_v27 = vpop.f32.mrf.mxu1  ;;  %v322_v28 = vmul.f32 0.70710677, %v296_v20  ;;  %v310_v45 = vmul.f32 0.5, %v280_v19  ;;  %v314_v49 = vmul.f32 0.5, %v296_v20 }
  0xdf   : > { %v321_v29 = vmul.f32 0.70710677, %v291_v23  ;;  %526 = verf.f32 %v318_v25  ;;  %v325_v30 = vmul.f32 0.70710677, %v307_v24  ;;  %v283_v31 = vadd.f32 %v456_v10, %v282_v26 }
  0xe0   : > { %v299_v32 = vadd.f32 %v456_v10, %v298_v27  ;;  %528 = verf.f32 %v322_v28  ;;  %v313_v54 = vmul.f32 0.5, %v291_v23  ;;  %v317_v58 = vmul.f32 0.5, %v307_v24 }
  0xe1   : > { %530 = verf.f32 %v321_v29  ;;  %v319_v33 = vmul.f32 0.70710677, %v283_v31  ;;  %v311_v63 = vmul.f32 0.5, %v283_v31 }
  0xe2   : > { %532 = verf.f32 %v325_v30  ;;  %v323_v34 = vmul.f32 0.70710677, %v299_v32  ;;  %v315_v3 = vmul.f32 0.5, %v299_v32 }
  0xe3   : > { %534 = verf.f32 %v319_v33 }
  0xe4   : > { %536 = verf.f32 %v323_v34 }
  0xea   : > { %v523_v35 = vpop.eup %522 }
  0xeb   : > { %v525_v36 = vpop.eup %524  ;;  %v336_v38 = vadd.f32 1.0, %v523_v35 }
  0xec   : > { %v340_v40 = vadd.f32 1.0, %v525_v36  ;;  %v527_v41 = vpop.eup %526 }
  0xed   : > { %v344_v42 = vmul.f32 %v336_v38, %v312_v37  ;;  %v529_v43 = vpop.eup %528  ;;  %v334_v46 = vadd.f32 1.0, %v527_v41 }
  0xee   : > { %v348_v44 = vmul.f32 %v340_v40, %v316_v39  ;;  %v531_v47 = vpop.eup %530  ;;  %v338_v50 = vadd.f32 1.0, %v529_v43 }
  0xef   : > { %v479_v48 = vpack.c.bf16 %v344_v42, %v344_v42  ;;  %v533_v51 = vpop.eup %532  ;;  %v342_v53 = vmul.f32 %v334_v46, %v310_v45  ;;  %v337_v55 = vadd.f32 1.0, %v531_v47 }
  0xf0   : > { %v483_v52 = vpack.c.bf16 %v348_v44, %v348_v44  ;;  %v535_v56 = vpop.eup %534  ;;  %v346_v57 = vmul.f32 %v338_v50, %v314_v49  ;;  %v341_v59 = vadd.f32 1.0, %v533_v51 }
  0xf1   : > { %385 = vst.msk [vmem:[%s597_s27 + $0x8] sm:$0xf] %vm382_vm3, %v479_v48  ;;  %v537_v60 = vpop.eup %536  ;;  %v477_v61 = vpack.c.bf16 %v342_v53, %v342_v53  ;;  %v345_v62 = vmul.f32 %v337_v55, %v313_v54  ;;  %v335_v0 = vadd.f32 1.0, %v535_v56 }
  0xf2   : > { %389 = vst.msk [vmem:[%s597_s27 + $0x18] sm:$0xf] %vm382_vm3, %v483_v52  ;;  %v481_v1 = vpack.c.bf16 %v346_v57, %v346_v57  ;;  %v349_v2 = vmul.f32 %v341_v59, %v317_v58  ;;  %v339_v4 = vadd.f32 1.0, %v537_v60 }
  0xf3   : > { %383 = vst.msk [vmem:[%s597_s27] sm:$0xf] %vm382_vm3, %v477_v61  ;;  %v480_v5 = vpack.c.bf16 %v345_v62, %v345_v62  ;;  %v343_v6 = vmul.f32 %v335_v0, %v311_v63 }
  0xf4   : > { %387 = vst.msk [vmem:[%s597_s27 + $0x10] sm:$0xf] %vm382_vm3, %v481_v1  ;;  %v484_v7 = vpack.c.bf16 %v349_v2, %v349_v2  ;;  %v347_v8 = vmul.f32 %v339_v4, %v315_v3 }
  0xf5   : > { %386 = vst.msk [vmem:[%s597_s27 + $0xc] sm:$0xf] %vm382_vm3, %v480_v5  ;;  %v478_v9 = vpack.c.bf16 %v343_v6, %v343_v6 }
  0xf6   : > { %390 = vst.msk [vmem:[%s597_s27 + $0x1c] sm:$0xf] %vm382_vm3, %v484_v7  ;;  %v482_v10 = vpack.c.bf16 %v347_v8, %v347_v8 }
  0xf7   : > { %384 = vst.msk [vmem:[%s597_s27 + $0x4] sm:$0xf] %vm382_vm3, %v478_v9 }
  0xf8   : > { %388 = vst.msk [vmem:[%s597_s27 + $0x14] sm:$0xf] %vm382_vm3, %v482_v10 }
  0xf9 PF: > { %s13_s12 = sadd.s32 1, %s544_s12  }
  0xfa   : > { %p10_p4 = scmp.ge.s32.totalorder %s13_s12, 4  }
  0xfc   :  { %12 = sbr.rel (!%p10_p4) target bundleno = 1 (0x1), region = 62 }

// kernel: _lambda_.3
= control target key start
LH: loop header
LB: loop body
LE: loop exit
PB: predicated region body
PF: predicated region fallthrough
CT: control target
= control target key end

     0   :  { %8 = vsyncpa [#allocation3], 0  ;;  %s689_s0 = inlined_call_operand.vmem [shape: bf16[32,144], index: 0, kind: input, shape index: {}]   ;;  %s690_s1 = inlined_call_operand.vmem [shape: bf16[144,32], index: 1, kind: input, shape index: {}]   ;;  %s691_s2 = inlined_call_operand.vmem [shape: f32[1,32], index: 2, kind: input, shape index: {}]   ;;  %s692_s3 = inlined_call_operand.hbm [shape: f32[32,32], index: 3, kind: output, shape index: {}]  }
   0x1   :  { %10 = vsyncpa [#allocation3 + $0x1], 0  ;;  %s558_s12 = smov 0   ;;  %s560_s13 = smov 0  }
   0x2   :  { %s562_s14 = smov 0   ;;  %s564_s15 = smov 0  }
   0x3 LB: > { %s579_s16 = sadd.s32 4294967295, %s532_s15   ;;  %s390_s17 = sadd.s32 4294967294, %s532_s15   ;;  %s532_s15 = sphi %s564_s15, %s698_s15   ;;  %s528_s14 = sphi %s562_s14, %s697_s14   ;;  %s524_s13 = sphi %s560_s13, %s696_s13   ;;  %s520_s12 = sphi %s558_s12, %s695_s12  }
   0x4   : > { %s583_s18 = sadd.s32 1, %s532_s15   ;;  %s91_s19 = sadd.s32 1, %s528_s14 }
   0x5   : > { %s88_s20 = ssub.s32 %s532_s15, %s583_s18  ;;  %p101_p0 = scmp.ne.s32.totalorder %s528_s14, %s524_s13 }
   0x6   : > { %p89_p1 = scmp.eq.s32.totalorder %s88_s20, 0  ;;  %p102_p2 = scmp.eq.s32.totalorder %s579_s16, 1 }
   0x7   : > { %p107_p3 = scmp.ne.s32.totalorder %s524_s13, %s520_s12  ;;  %p108_p4 = scmp.eq.s32.totalorder %s390_s17, 1 }
   0x8   : > { %s594_s21 = scalar_select %p89_p1, %s528_s14, %s91_s19  }
   0x9   : > { %p596_p5 = por %p102_p2, %p101_p0  ;;  %p600_p6 = por %p108_p4, %p107_p3 }
   0xa   : > { %p393_p7 = scmp.ge.s32.totalorder %s532_s15, 1  ;;  %p142_p8 = scmp.lt.s32.totalorder %s532_s15, 3 }
   0xc   : > { %p143_p9 = pnand %p393_p7, %p142_p8 }
   0xd   : > { %s395_s26 = sshll.u32 (!%p143_p9), %s579_s16, 1  ;;  %s164_s29 = sand.u32 (!%p143_p9), 1, %s524_s13  }
   0xe   : > { %146 = sbr.rel (%p143_p9) target bundleno = 269 (0x10d), region = 32  ;;  %p168_p10 = scmp.lt.s32.totalorder (!%p143_p9), %s395_s26, 3 }
   0xf   : > { %s394_s30 = sshll.u32 (!%p143_p9), %s164_s29, 4  ;;  %s417_s9 = sshll.u32 (!%p143_p9), %s579_s16, 8 }
  0x10   : > { %s166_s6 = scalar_lea.vmem (!%p143_p9), [#allocation2], %s394_s30  ;;  %s647_s11 = scalar_lea.hbm (!%p143_p9), %s692_s3, %s417_s9 }
  0x11   : > { %s328_s8 = sshll.u32 (!%p143_p9), %s166_s6, 4  ;;  %s649_s17 = scalar_lea.sflag (!%p143_p9), [#allocation3], %s164_s29  ;;  %s642_s8 = int_to_ptr.vmem [resolvable:$true] %s328_s8 }
  0x12   : > { %s472_s19 = scalar_lea.vmem (!%p143_p9), %s642_s8, 256  ;;  %s535_s16 = smov (!%p143_p9), [#allocation2]  }
  0x13   : > { %v460_v0 = vld [vmem:[%s690_s1 + $0x38] sm:$0xff]   ;;  %v534_v1 = vmov 0   ;;  %v461_v2 = vld [vmem:[%s690_s1 + $0x30] sm:$0xff]   ;;  %s700_s26 = smov (!%p168_p10, %s395_s26), 3  ;;  %v462_v3 = vld [vmem:[%s690_s1 + $0x28] sm:$0xff]   ;;  %vm266_vm0 = vcmask 130048   ;;  %p473_p11 = scmp.ne.s32.totalorder %s642_s8, %s472_s19 }
  0x14   : > { %270 = vmatprep.subr.bf16.mxu0 %v534_v1  ;;  %s416_s4 = sshll.u32 %s700_s26, 3  ;;  %v463_v4 = vld [vmem:[%s690_s1 + $0x20] sm:$0xff]   ;;  %v464_v6 = vld [vmem:[%s690_s1 + $0x18] sm:$0xff]   ;;  %v465_v7 = vld [vmem:[%s690_s1 + $0x10] sm:$0xff]   ;;  %vm311_vm1 = vcmask 261120   ;;  %s476_s20 = sshll.u32 %s535_s16, 4  ;;  %s477_s20 = int_to_ptr.vmem [resolvable:$false] %s476_s20 }
  0x15   : > { %271 = vmatpush1.bf16.msra.mxu0 %v460_v0  ;;  %s172_s7 = scalar_lea.vmem %s689_s0, %s416_s4  ;;  %v466_v8 = vld [vmem:[%s690_s1 + $0x8] sm:$0xff]   ;;  %v467_v9 = vld [vmem:[%s690_s1] sm:$0xff]   ;;  %p474_p12 = pnand %p473_p11, %p596_p5 }
  0x16   : > { %272 = vmatprep.subr.bf16.mxu0 %v534_v1  ;;  %v471_v5 = vld [vmem:[%s172_s7 + $0x4] ss:$8 sps:$4 sm:$0xff]   ;;  %v469_v11 = vld [vmem:[%s172_s7] ss:$8 sps:$4 sm:$0xff]   ;;  %s478_s24 = scalar_lea.vmem %s477_s20, 512  ;;  %p479_p0 = scmp.lt.s32.totalorder %s642_s8, %s477_s20 }
  0x17   : > { %410 = vmatprep.mubr.msk.bf16.mxu0 %vm266_vm0, %v471_v5  ;;  %v468_v10 = vld [vmem:[%s690_s1 + $0x40] sm:$0xff]   ;;  %p475_p13 = pneg %p474_p12  ;;  %p480_p1 = scmp.lt.s32.totalorder %s478_s24, %s472_s19 }
  0x18   : > { %v398_v12 = vld [vmem:[%s691_s2] ss:$0 sm:$0xff] }
  0x19   : > { %273 = vmatpush1.bf16.msra.mxu0 %v461_v2  ;;  %p481_p2 = por %p480_p1, %p479_p0 }
  0x1a   : > { %274 = vmatprep.subr.bf16.mxu0 %v534_v1 }
  0x1b   : > { %p482_p3 = pnand %p481_p2, %p475_p13 }
  0x1d   : > { %275 = vmatpush1.bf16.msra.mxu0 %v462_v3 }
  0x1e   : > { %276 = vmatprep.subr.bf16.mxu0 %v534_v1 }
  0x21   : > { %277 = vmatpush1.bf16.msra.mxu0 %v463_v4 }
  0x22   : > { %278 = vmatprep.subr.bf16.mxu0 %v534_v1 }
  0x25   : > { %279 = vmatpush1.bf16.msra.mxu0 %v464_v6 }
  0x26   : > { %280 = vmatprep.subr.bf16.mxu0 %v534_v1 }
  0x29   : > { %281 = vmatpush1.bf16.msra.mxu0 %v465_v7 }
  0x2a   : > { %282 = vmatprep.subr.bf16.mxu0 %v534_v1 }
  0x2d   : > { %283 = vmatpush1.bf16.msra.mxu0 %v466_v8 }
  0x2e   : > { %284 = vmatprep.subr.bf16.mxu0 %v534_v1 }
  0x31   : > { %285 = vmatpush1.bf16.msra.mxu0 %v467_v9 }
  0x32   : > { %300 = vmatprep.subr.bf16.mxu0 %v534_v1 }
  0x35   : > { %301 = vmatpush2.bf16.msra.mxu0 %v468_v10 }
  0x38   : > { %303 = vmatmul.mubr.bf16.vlgmr.msra.gmra.mxu0 %v469_v11 }
  0xf8   : > { %v304_v13 = vpop.f32.mrf.mxu0 }
  0xf9   : > { %v305_v14 = vadd.f32 %v398_v12, %v304_v13 }
  0xfa   : > { %v306_v15 = vpop.f32.mrf.mxu0 }
  0xfb   : > { %312 = vst.msk [vmem:[%s166_s6] sm:$0xff] %vm311_vm1, %v305_v14 }
  0xfc   : > { %v307_v16 = vpop.f32.mrf.mxu0 }
  0xfd   : > { %v308_v17 = vadd.f32 %v398_v12, %v307_v16 }
  0xfe   : > { %v309_v18 = vpop.f32.mrf.mxu0 }
  0xff   : > { %313 = vst.msk [vmem:[%s166_s6 + $0x8] sm:$0xff] %vm311_vm1, %v308_v17 }
 0x100   : > { %485 = shalt.err (!%p482_p3)
}
 0x101   : > { %s486_s25 = scalar_lea.hbm %s647_s11, 256  ;;  %s490_s28 = scalar_lea.hbm %s692_s3, 512 }
 0x102   : > { %p487_p4 = scmp.ne.s32.totalorder %s647_s11, %s486_s25  ;;  %p491_p9 = scmp.lt.s32.totalorder %s647_s11, %s692_s3 }
 0x103   : > { %p492_p10 = scmp.lt.s32.totalorder %s490_s28, %s486_s25 }
 0x104   : > { %p488_p7 = pnand %p487_p4, %p596_p5 }
 0x105   : > { %p493_p11 = por %p492_p10, %p491_p9 }
 0x106   : > { %p489_p8 = pneg %p488_p7 }
 0x108   : > { %p494_p12 = pnand %p493_p11, %p489_p8 }
 0x10a   : > { %497 = shalt.err (!%p494_p12)
}
 0x10b   : > { %s536_s4 = smov 128   ;;  %s537_s5 = smov 8  }
 0x10c   : > { %418 = dma.vmem_to_hbm [thread:$0]  (%p596_p5), %s642_s8, 256, %s647_s11, %s649_s17, %s536_s4, %s536_s4, %s537_s5  }
 0x10d PF: > { %p424_p13 = scmp.ge.s32.totalorder %s532_s15, 2  ;;  %s343_s6 = sand.u32 1, %s520_s12  }
 0x10e   : > { %s344_s9 = scalar_lea.sflag [#allocation3], %s343_s6 }
 0x10f   : > { %p421_p0 = pnand %p424_p13, %p600_p6 }
 0x111   : > { %p422_p1 = pneg %p421_p0 }
 0x113   : > { %515 = dma.done.wait (%p422_p1), %s344_s9, 256  }
 0x114   : > { %517 = vsyncadd (%p422_p1), %s344_s9, 4294967040  ;;  %p13_p2 = scmp.ge.s32.totalorder %s583_s18, 4   ;;  %s695_s12 = smov %s524_s13 }
 0x115   : > { %s696_s13 = smov %s528_s14  ;;  %s697_s14 = smov %s594_s21 }
 0x116   : > { %s698_s15 = smov %s583_s18  ;;  %15 = sbr.rel (!%p13_p2) target bundleno = 3 (0x3), region = 67 }
 0x11b   :  { %349 = vsyncpa [#allocation3], 1 }
 0x11c   :  { %351 = vsyncpa [#allocation3 + $0x1], 1 }

</bundles_post_ra>
